<compile_context>
chip_gen: v7x
topology: tpu7x:2x2x1
jax: 0.10.0
libtpu: 0.0.40
codegen_flags: <defaults>
</compile_context>

<pallas_src>
import functools

import jax
import jax.numpy as jnp
from jax.experimental import pallas as pl
from jax.experimental.pallas import tpu as pltpu


# ---------------------------------------------------------------------------
# mask generation (equivalent of generateGridWeightMask_PredPrey)
# ---------------------------------------------------------------------------
def generate_grid_weight_mask(image_size):
    """Grid adjacency mask: each pixel connects to itself + 8 neighbours."""
    n = image_size * image_size
    rows = jnp.arange(n) // image_size
    cols = jnp.arange(n) % image_size
    dr = jnp.abs(rows[:, None] - rows[None, :])
    dc = jnp.abs(cols[:, None] - cols[None, :])
    weight_mask = ((dr <= 1) & (dc <= 1)).astype(jnp.float32)   # (n, n)
    diag_mask = jnp.eye(n, dtype=jnp.float32)                   # (n, n)
    return weight_mask, diag_mask


# ---------------------------------------------------------------------------
# Kernel 1: per-species recurrence.  grid=(2,) over {pred, prey}.
#   wh_ref   : (1, N, N) bf16   -- already transposed AND pre-scaled by s
#   bias_ref : (1, 1, N) f32    -- s * bh
#   wdiag_ref: (1, 1, N) f32    -- s * diag(Wi)
# inner body:  u = tanh(u @ Wh' + c),   c = bias + X * wdiag (loop-invariant)
# ---------------------------------------------------------------------------
def _species_kernel(x_ref, u0_ref, wh_ref, bias_ref, wdiag_ref, u_out_ref,
                    *, layers):
    f32 = jnp.float32
    bf16 = jnp.bfloat16

    x = x_ref[...]                       # (B, N) f32
    wh = wh_ref[0]                       # (N, N) bf16, scaled + transposed
    c = bias_ref[0] + x * wdiag_ref[0]   # (B, N) f32, loop-invariant
    u = u0_ref[0]                        # (B, N) f32

    # layers is a static python int -> unrolled dependent chain
    for _ in range(layers):
        v = jnp.dot(u.astype(bf16), wh, preferred_element_type=f32) + c
        u = jnp.tanh(v)

    u_out_ref[0] = u


# ---------------------------------------------------------------------------
# Kernel 2: output head.  tags = concat(u_pred, u_prey, cave) @ W1.T done as
# three slab matmuls against static slices of the (3N, H) transposed weight.
# ---------------------------------------------------------------------------
def _head_kernel(u_ref, cave_ref, w1_ref, b1_ref, w2_ref, b2_ref, out_ref,
                 *, num_pixels):
    f32 = jnp.float32
    bf16 = jnp.bfloat16
    n = num_pixels

    u_pred = u_ref[0].astype(bf16)       # (B, N)
    u_prey = u_ref[1].astype(bf16)       # (B, N)
    cave = cave_ref[...].astype(bf16)    # (B, N)

    h = (jnp.dot(u_pred, w1_ref[0:n, :], preferred_element_type=f32)
         + jnp.dot(u_prey, w1_ref[n:2 * n, :], preferred_element_type=f32)
         + jnp.dot(cave, w1_ref[2 * n:3 * n, :], preferred_element_type=f32)
         + b1_ref[...])
    h = jnp.tanh(h)

    label = jnp.tanh(jnp.dot(h, w2_ref[...], preferred_element_type=f32)
                     + b2_ref[...])
    out_ref[...] = label.astype(out_ref.dtype)


# ---------------------------------------------------------------------------
# wrapper
# ---------------------------------------------------------------------------
def recurrent_scaled_grid_predprey(kp, X, pred, prey, cave, *, layers,
                                   num_pixels):
    B = X.shape[0]
    N = num_pixels
    u0_stack = jnp.stack([pred, prey])               # (2, B, N)

    # --- kernel 1: the two independent recurrent chains -------------------
    species_kernel = functools.partial(_species_kernel, layers=layers)
    u_stack = pl.pallas_call(
        species_kernel,
        out_shape=jax.ShapeDtypeStruct((2, B, N), jnp.float32),
        grid=(2,),
        in_specs=[
            pl.BlockSpec((B, N), lambda i: (0, 0)),          # X (shared)
            pl.BlockSpec((1, B, N), lambda i: (i, 0, 0)),    # u0 per species
            pl.BlockSpec((1, N, N), lambda i: (i, 0, 0)),    # Wh' (bf16)
            pl.BlockSpec((1, 1, N), lambda i: (i, 0, 0)),    # s*bh
            pl.BlockSpec((1, 1, N), lambda i: (i, 0, 0)),    # s*diag(Wi)
        ],
        out_specs=pl.BlockSpec((1, B, N), lambda i: (i, 0, 0)),
        compiler_params=pltpu.CompilerParams(
            dimension_semantics=("parallel",)),
    )(X, u0_stack, kp["wh_T_scaled"], kp["bias_scaled"], kp["wdiag_scaled"])

    # --- kernel 2: output head --------------------------------------------
    head_inputs = (u_stack, cave, kp["w1_T"], kp["b1"], kp["w2_T"], kp["b2"])

    def full_spec(arr):
        # whole array as one VMEM block
        return pl.BlockSpec(arr.shape, lambda: (0,) * arr.ndim)

    head_kernel = functools.partial(_head_kernel, num_pixels=N)
    return pl.pallas_call(
        head_kernel,
        out_shape=jax.ShapeDtypeStruct((B, 2), jnp.float32),
        grid=(),
        in_specs=[full_spec(a) for a in head_inputs],
        out_specs=pl.BlockSpec((B, 2), lambda: (0, 0)),
    )(*head_inputs)


# ---------------------------------------------------------------------------
# pure-JAX reference (mirrors the PyTorch forward exactly, f32 end-to-end)
# ---------------------------------------------------------------------------
def reference_forward(raw, X, pred, prey, cave, *, layers):
    def repeated(u0, wh, bh, wi_diag, s):
        wi = jnp.diag(wi_diag)           # inputWeight is diagonal-only
        u = u0
        for _ in range(layers):
            v = u @ wh.T + bh + X @ wi.T
            u = jnp.tanh(v * s)
        return u

    pred_range = repeated(pred, raw["wh_pred"], raw["bh_pred"],
                          raw["wi_pred_diag"], raw["s_pred"])
    prey_range = repeated(prey, raw["wh_prey"], raw["bh_prey"],
                          raw["wi_prey_diag"], raw["s_prey"])
    tags = jnp.concatenate([pred_range, prey_range, cave], axis=1)
    h = jnp.tanh(tags @ raw["w1"].T + raw["b1"])
    return jnp.tanh(h @ raw["w2"].T + raw["b2"])


# ---------------------------------------------------------------------------
# deterministic parameter init (torch layout) + kernel-side weight prep
# ---------------------------------------------------------------------------
def init_params(key, num_pixels, H_decision, image_size):
    weight_mask, _ = generate_grid_weight_mask(image_size)
    n = num_pixels
    ks = jax.random.split(key, 10)
    bound_h = 1.0 / (n ** 0.5)
    bound_1 = 1.0 / ((3.0 * n) ** 0.5)
    bound_2 = 1.0 / (H_decision ** 0.5)

    def unif(k, shape, b):
        return jax.random.uniform(k, shape, jnp.float32, -b, b)

    # hiddenWeight: masked by grid adjacency.  inputWeight: diagonal-only
    # (zeroed in torch __init__; given diagonal values here so the recurrence
    #  is non-trivial while respecting the backward-hook sparsity).
    raw = {
        "wh_pred": unif(ks[0], (n, n), bound_h) * weight_mask,
        "wh_prey": unif(ks[1], (n, n), bound_h) * weight_mask,
        "wi_pred_diag": unif(ks[2], (n,), bound_h),
        "wi_prey_diag": unif(ks[3], (n,), bound_h),
        "bh_pred": unif(ks[4], (n,), bound_h),
        "bh_prey": unif(ks[5], (n,), bound_h),
        "s_pred": jnp.float32(2.0),
        "s_prey": jnp.float32(2.0),
        "w1": unif(ks[6], (H_decision, 3 * n), bound_1),
        "b1": unif(ks[7], (H_decision,), bound_1),
        "w2": unif(ks[8], (2, H_decision), bound_2),
        "b2": unif(ks[9], (2,), bound_2),
    }
    return raw


def prep_kernel_params(raw):
    """Fold scalar into weights, transpose, cast matmul weights to bf16."""
    def prep_species(wh, bh, wi_diag, s):
        wh_T_scaled = (s * wh.T).astype(jnp.bfloat16)     # (N, N) bf16
        bias_scaled = (s * bh)[None, :]                   # (1, N) f32
        wdiag_scaled = (s * wi_diag)[None, :]             # (1, N) f32
        return wh_T_scaled, bias_scaled, wdiag_scaled

    a = prep_species(raw["wh_pred"], raw["bh_pred"],
                     raw["wi_pred_diag"], raw["s_pred"])
    b = prep_species(raw["wh_prey"], raw["bh_prey"],
                     raw["wi_prey_diag"], raw["s_prey"])
    return {
        "wh_T_scaled": jnp.stack([a[0], b[0]]),           # (2, N, N) bf16
        "bias_scaled": jnp.stack([a[1], b[1]]),           # (2, 1, N) f32
        "wdiag_scaled": jnp.stack([a[2], b[2]]),          # (2, 1, N) f32
        "w1_T": raw["w1"].T.astype(jnp.bfloat16),         # (3N, H) bf16
        "b1": raw["b1"][None, :],                         # (1, H) f32
        "w2_T": raw["w2"].T,                              # (H, 2) f32
        "b2": raw["b2"][None, :],                         # (1, 2) f32
    }


if __name__ == "__main__":
    B = 8
    image_size = 16
    num_pixels = image_size * image_size   # 256
    layers = 8
    H_decision = 32

    key = jax.random.PRNGKey(0)
    k_p, k_x, k_pred, k_prey, k_cave = jax.random.split(key, 5)

    raw = init_params(k_p, num_pixels, H_decision, image_size)
    kp = prep_kernel_params(raw)

    X = jax.random.normal(k_x, (B, num_pixels), jnp.float32)
    pred = jax.random.normal(k_pred, (B, num_pixels), jnp.float32)
    prey = jax.random.normal(k_prey, (B, num_pixels), jnp.float32)
    cave = jax.random.normal(k_cave, (B, num_pixels), jnp.float32)

    out = recurrent_scaled_grid_predprey(
        kp, X, pred, prey, cave, layers=layers, num_pixels=num_pixels)
    out = jax.block_until_ready(out)

    ref = jax.block_until_ready(
        reference_forward(raw, X, pred, prey, cave, layers=layers))
    assert out.shape == (B, 2)
    err = float(jnp.max(jnp.abs(out - ref)))
    assert err < 5e-2, f"max abs err {err}"

    print("KERNEL_OK")
</pallas_src>

<mosaic_0001>
module attributes {stable_mosaic.version = 11 : i64} {
  func.func @_species_kernel(%arg0: i32, %arg1: memref<8x256xf32, #tpu.memory_space<vmem>>, %arg2: memref<1x8x256xf32, #tpu.memory_space<vmem>>, %arg3: memref<1x256x256xbf16, #tpu.memory_space<vmem>>, %arg4: memref<1x1x256xf32, #tpu.memory_space<vmem>>, %arg5: memref<1x1x256xf32, #tpu.memory_space<vmem>>, %arg6: memref<1x8x256xf32, #tpu.memory_space<vmem>>) attributes {dimension_semantics = [#tpu.dimension_semantics<parallel>], iteration_bounds = array<i64: 2>, scalar_prefetch = 0 : i64, scratch_operands = 0 : i64, tpu.core_type = #tpu.core_type<tc>, window_params = [{pipeline_mode = #tpu.pipeline_mode<synchronous>, transform_indices = @transform_0, window_bounds = array<i64: 8, 256>}, {transform_indices = @transform_1, window_bounds = array<i64: 1, 8, 256>}, {transform_indices = @transform_2, window_bounds = array<i64: 1, 256, 256>}, {transform_indices = @transform_3, window_bounds = array<i64: 1, 1, 256>}, {transform_indices = @transform_4, window_bounds = array<i64: 1, 1, 256>}, {transform_indices = @transform_5, window_bounds = array<i64: 1, 8, 256>}]} {
    %c0 = arith.constant 0 : index
    %c0_0 = arith.constant 0 : index
    %0 = vector.load %arg1[%c0, %c0_0] : memref<8x256xf32, #tpu.memory_space<vmem>>, vector<8x256xf32>
    %c0_1 = arith.constant 0 : index
    %c0_2 = arith.constant 0 : index
    %c0_3 = arith.constant 0 : index
    %1 = vector.load %arg3[%c0_1, %c0_2, %c0_3] : memref<1x256x256xbf16, #tpu.memory_space<vmem>>, vector<1x256x256xbf16>
    %2 = vector.shape_cast %1 : vector<1x256x256xbf16> to vector<256x256xbf16>
    %c0_4 = arith.constant 0 : index
    %c0_5 = arith.constant 0 : index
    %c0_6 = arith.constant 0 : index
    %3 = vector.load %arg4[%c0_4, %c0_5, %c0_6] : memref<1x1x256xf32, #tpu.memory_space<vmem>>, vector<1x1x256xf32>
    %4 = vector.shape_cast %3 : vector<1x1x256xf32> to vector<1x256xf32>
    %c0_7 = arith.constant 0 : index
    %c0_8 = arith.constant 0 : index
    %c0_9 = arith.constant 0 : index
    %5 = vector.load %arg5[%c0_7, %c0_8, %c0_9] : memref<1x1x256xf32, #tpu.memory_space<vmem>>, vector<1x1x256xf32>
    %6 = vector.shape_cast %5 : vector<1x1x256xf32> to vector<1x256xf32>
    %7 = vector.broadcast %6 : vector<1x256xf32> to vector<8x256xf32>
    %8 = arith.mulf %0, %7 : vector<8x256xf32>
    %9 = vector.broadcast %4 : vector<1x256xf32> to vector<8x256xf32>
    %10 = arith.addf %9, %8 : vector<8x256xf32>
    %c0_10 = arith.constant 0 : index
    %c0_11 = arith.constant 0 : index
    %c0_12 = arith.constant 0 : index
    %11 = vector.load %arg2[%c0_10, %c0_11, %c0_12] : memref<1x8x256xf32, #tpu.memory_space<vmem>>, vector<1x8x256xf32>
    %12 = vector.shape_cast %11 : vector<1x8x256xf32> to vector<8x256xf32>
    %13 = arith.truncf %12 : vector<8x256xf32> to vector<8x256xbf16>
    %cst = arith.constant dense<0.000000e+00> : vector<8x256xf32>
    %14 = tpu.matmul %13, %2, %cst {dimension_numbers = #tpu.dot_dimension_numbers<[1], [0], [0], [1], [0, 0, 1, 1], [], []>} : vector<8x256xbf16>, vector<256x256xbf16>, vector<8x256xf32> -> vector<8x256xf32>
    %15 = arith.addf %14, %10 : vector<8x256xf32>
    %16 = math.tanh %15 : vector<8x256xf32>
    %17 = arith.truncf %16 : vector<8x256xf32> to vector<8x256xbf16>
    %cst_13 = arith.constant dense<0.000000e+00> : vector<8x256xf32>
    %18 = tpu.matmul %17, %2, %cst_13 {dimension_numbers = #tpu.dot_dimension_numbers<[1], [0], [0], [1], [0, 0, 1, 1], [], []>} : vector<8x256xbf16>, vector<256x256xbf16>, vector<8x256xf32> -> vector<8x256xf32>
    %19 = arith.addf %18, %10 : vector<8x256xf32>
    %20 = math.tanh %19 : vector<8x256xf32>
    %21 = arith.truncf %20 : vector<8x256xf32> to vector<8x256xbf16>
    %cst_14 = arith.constant dense<0.000000e+00> : vector<8x256xf32>
    %22 = tpu.matmul %21, %2, %cst_14 {dimension_numbers = #tpu.dot_dimension_numbers<[1], [0], [0], [1], [0, 0, 1, 1], [], []>} : vector<8x256xbf16>, vector<256x256xbf16>, vector<8x256xf32> -> vector<8x256xf32>
    %23 = arith.addf %22, %10 : vector<8x256xf32>
    %24 = math.tanh %23 : vector<8x256xf32>
    %25 = arith.truncf %24 : vector<8x256xf32> to vector<8x256xbf16>
    %cst_15 = arith.constant dense<0.000000e+00> : vector<8x256xf32>
    %26 = tpu.matmul %25, %2, %cst_15 {dimension_numbers = #tpu.dot_dimension_numbers<[1], [0], [0], [1], [0, 0, 1, 1], [], []>} : vector<8x256xbf16>, vector<256x256xbf16>, vector<8x256xf32> -> vector<8x256xf32>
    %27 = arith.addf %26, %10 : vector<8x256xf32>
    %28 = math.tanh %27 : vector<8x256xf32>
    %29 = arith.truncf %28 : vector<8x256xf32> to vector<8x256xbf16>
    %cst_16 = arith.constant dense<0.000000e+00> : vector<8x256xf32>
    %30 = tpu.matmul %29, %2, %cst_16 {dimension_numbers = #tpu.dot_dimension_numbers<[1], [0], [0], [1], [0, 0, 1, 1], [], []>} : vector<8x256xbf16>, vector<256x256xbf16>, vector<8x256xf32> -> vector<8x256xf32>
    %31 = arith.addf %30, %10 : vector<8x256xf32>
    %32 = math.tanh %31 : vector<8x256xf32>
    %33 = arith.truncf %32 : vector<8x256xf32> to vector<8x256xbf16>
    %cst_17 = arith.constant dense<0.000000e+00> : vector<8x256xf32>
    %34 = tpu.matmul %33, %2, %cst_17 {dimension_numbers = #tpu.dot_dimension_numbers<[1], [0], [0], [1], [0, 0, 1, 1], [], []>} : vector<8x256xbf16>, vector<256x256xbf16>, vector<8x256xf32> -> vector<8x256xf32>
    %35 = arith.addf %34, %10 : vector<8x256xf32>
    %36 = math.tanh %35 : vector<8x256xf32>
    %37 = arith.truncf %36 : vector<8x256xf32> to vector<8x256xbf16>
    %cst_18 = arith.constant dense<0.000000e+00> : vector<8x256xf32>
    %38 = tpu.matmul %37, %2, %cst_18 {dimension_numbers = #tpu.dot_dimension_numbers<[1], [0], [0], [1], [0, 0, 1, 1], [], []>} : vector<8x256xbf16>, vector<256x256xbf16>, vector<8x256xf32> -> vector<8x256xf32>
    %39 = arith.addf %38, %10 : vector<8x256xf32>
    %40 = math.tanh %39 : vector<8x256xf32>
    %41 = arith.truncf %40 : vector<8x256xf32> to vector<8x256xbf16>
    %cst_19 = arith.constant dense<0.000000e+00> : vector<8x256xf32>
    %42 = tpu.matmul %41, %2, %cst_19 {dimension_numbers = #tpu.dot_dimension_numbers<[1], [0], [0], [1], [0, 0, 1, 1], [], []>} : vector<8x256xbf16>, vector<256x256xbf16>, vector<8x256xf32> -> vector<8x256xf32>
    %43 = arith.addf %42, %10 : vector<8x256xf32>
    %44 = math.tanh %43 : vector<8x256xf32>
    %c0_20 = arith.constant 0 : index
    %c0_21 = arith.constant 0 : index
    %c0_22 = arith.constant 0 : index
    %45 = vector.load %arg6[%c0_20, %c0_21, %c0_22] : memref<1x8x256xf32, #tpu.memory_space<vmem>>, vector<1x8x256xf32>
    %46 = vector.shape_cast %45 : vector<1x8x256xf32> to vector<8x256xf32>
    %47 = vector.shape_cast %44 : vector<8x256xf32> to vector<1x8x256xf32>
    tpu.vector_store %arg6[%c0_20, %c0_21, %c0_22], %47 {strides = array<i32>} : memref<1x8x256xf32, #tpu.memory_space<vmem>>, vector<1x8x256xf32>,
    return
  }
  func.func @transform_0(%arg0: i32) -> (i32, i32) {
    %c0_i32 = arith.constant 0 : i32
    %c0_i32_0 = arith.constant 0 : i32
    %c0_i32_1 = arith.constant 0 : i32
    return %c0_i32, %c0_i32_0 : i32, i32
  }
  func.func @transform_1(%arg0: i32) -> (i32, i32, i32) {
    %c0_i32 = arith.constant 0 : i32
    %c0_i32_0 = arith.constant 0 : i32
    %c0_i32_1 = arith.constant 0 : i32
    return %arg0, %c0_i32, %c0_i32_0 : i32, i32, i32
  }
  func.func @transform_2(%arg0: i32) -> (i32, i32, i32) {
    %c0_i32 = arith.constant 0 : i32
    %c0_i32_0 = arith.constant 0 : i32
    %c0_i32_1 = arith.constant 0 : i32
    return %arg0, %c0_i32, %c0_i32_0 : i32, i32, i32
  }
  func.func @transform_3(%arg0: i32) -> (i32, i32, i32) {
    %c0_i32 = arith.constant 0 : i32
    %c0_i32_0 = arith.constant 0 : i32
    %c0_i32_1 = arith.constant 0 : i32
    return %arg0, %c0_i32, %c0_i32_0 : i32, i32, i32
  }
  func.func @transform_4(%arg0: i32) -> (i32, i32, i32) {
    %c0_i32 = arith.constant 0 : i32
    %c0_i32_0 = arith.constant 0 : i32
    %c0_i32_1 = arith.constant 0 : i32
    return %arg0, %c0_i32, %c0_i32_0 : i32, i32, i32
  }
  func.func @transform_5(%arg0: i32) -> (i32, i32, i32) {
    %c0_i32 = arith.constant 0 : i32
    %c0_i32_0 = arith.constant 0 : i32
    %c0_i32_1 = arith.constant 0 : i32
    return %arg0, %c0_i32, %c0_i32_0 : i32, i32, i32
  }
}

</mosaic_0001>

<bundles_post_ra>
// kernel: tpu_custom_call.1
= control target key start
LH: loop header
LB: loop body
LE: loop exit
PB: predicated region body
PF: predicated region fallthrough
CT: control target
= control target key end

     0   :  { %s2079_s0 = inlined_call_operand.hbm [shape: f32[8,256], index: 0, kind: input, shape index: {}]   ;;  %s2080_s1 = inlined_call_operand.hbm [shape: f32[2,8,256], index: 1, kind: input, shape index: {}]   ;;  %s2081_s2 = inlined_call_operand.hbm [shape: bf16[2,256,256], index: 2, kind: input, shape index: {}]   ;;  %s2082_s3 = inlined_call_operand.vmem [shape: f32[2,1,256], index: 3, kind: input, shape index: {}]   ;;  %s2083_s4 = inlined_call_operand.vmem [shape: f32[2,1,256], index: 4, kind: input, shape index: {}]   ;;  %s2084_s5 = inlined_call_operand.hbm [shape: f32[2,8,256], index: 5, kind: output, shape index: {}]  }
   0x1   :  { %2089 = sst [smem:[#allocation12_spill]] %s2080_s1 }
   0x2   :  { %2090 = sst [smem:[#allocation13_spill]] %s2081_s2 }
   0x3   :  { %10 = vsyncpa [#allocation3], 0 }
   0x4   :  { %11 = vsyncpa [#allocation6], 0 }
   0x5   :  { %13 = vsyncpa [#allocation6 + $0x1], 0 }
   0x6   :  { %14 = vsyncpa [#allocation4], 0 }
   0x7   :  { %16 = vsyncpa [#allocation4 + $0x1], 0  ;;  %s1449_s18 = smov 0   ;;  %s1451_s19 = smov 0  }
   0x8   :  { %s1453_s20 = smov 0   ;;  %s1455_s21 = smov 0  }
   0x9 LB: > { %s1470_s22 = sadd.s32 1, %s1411_s21   ;;  %s50_s23 = sadd.s32 1, %s1407_s20  ;;  %s1411_s21 = sphi %s1455_s21, %s2109_s21   ;;  %s1407_s20 = sphi %s1453_s20, %s2108_s20   ;;  %s1403_s19 = sphi %s1451_s19, %s2107_s19   ;;  %s1399_s18 = sphi %s1449_s18, %s2106_s18  }
   0xa   : > { %s47_s24 = ssub.s32 %s1411_s21, %s1470_s22  ;;  %p57_p0 = scmp.ne.s32.totalorder %s1407_s20, %s1403_s19 }
   0xb   : > { %p48_p1 = scmp.eq.s32.totalorder %s47_s24, 0  ;;  %p58_p2 = scmp.eq.s32.totalorder %s1411_s21, 0 }
   0xc   : > { %p1135_p4 = scmp.lt.s32.totalorder %s1411_s21, 2  ;;  %s202_s26 = sand.u32 1, %s1411_s21  }
   0xd   : > { %s1481_s25 = scalar_select %p48_p1, %s1407_s20, %s50_s23  }
   0xe   : > { %p59_p5 = por %p58_p2, %p57_p0  ;;  %s204_s27 = sand.u32 1, %s1407_s20  }
   0xf   : > { %s1056_s28 = sshll.u32 %s204_s27, 4  ;;  %s1106_s29 = sshll.u32 %s1411_s21, 8 }
  0x10   : > { %s2091_s1 = sld [smem:[#allocation12_spill]]  ;;  %s206_s8 = scalar_lea.vmem [#allocation5], %s1056_s28 }
  0x11   : > { %s214_s9 = sshll.u32 %s206_s8, 4  ;;  %p1494_p6 = pnand %p1135_p4, %p59_p5  ;;  %s1498_s9 = int_to_ptr.vmem [resolvable:$true] %s214_s9 }
  0x12   : > { %s1500_s11 = sshll.u32 %s204_s27, 8  ;;  %s1502_s12 = scalar_lea.sflag [#allocation6], %s202_s26 }
  0x13   : > { %p1255_p8 = pneg %p1494_p6 }
  0x16   : > { %s1492_s7 = scalar_lea.hbm %s2091_s1, %s1106_s29  ;;  %s1258_s16 = scalar_lea.hbm %s2091_s1, 512 }
  0x17   : > { %s1253_s13 = scalar_lea.hbm %s1492_s7, 256  ;;  %p1259_p11 = scmp.lt.u32.totalorder %s1492_s7, %s2091_s1 }
  0x18   : > { %p1254_p7 = scmp.ne.s32.totalorder %s1492_s7, %s1253_s13  ;;  %p1260_p12 = scmp.lt.u32.totalorder %s1258_s16, %s1253_s13 }
  0x19   : > { %p1262_p1 = scmp.lt.u32.totalorder %s1253_s13, %s1492_s7 }
  0x1a   : > { %p1256_p9 = pnand %p1255_p8, %p1254_p7  ;;  %p1261_p13 = por %p1260_p12, %p1259_p11 }
  0x1c   : > { %p1257_p10 = pneg %p1256_p9  ;;  %p1263_p2 = por %p1262_p1, %p1261_p13 }
  0x1e   : > { %p1264_p4 = pnand %p1263_p2, %p1257_p10 }
  0x20   : > { %1267 = shalt.err (!%p1264_p4)
}
  0x21   : > { %s1268_s24 = scalar_lea.vmem %s1498_s9, 256  ;;  %s1413_s26 = smov [#allocation5]  }
  0x22   : > { %p1269_p5 = scmp.ne.s32.totalorder %s1498_s9, %s1268_s24  ;;  %s1273_s27 = sshll.u32 %s1413_s26, 4  ;;  %s1274_s27 = int_to_ptr.vmem [resolvable:$false] %s1273_s27 }
  0x23   : > { %s1275_s28 = scalar_lea.vmem %s1274_s27, 512  ;;  %p1276_p3 = scmp.lt.s32.totalorder %s1498_s9, %s1274_s27 }
  0x24   : > { %p1271_p7 = pnand %p1269_p5, %p1255_p8  ;;  %p1277_p11 = scmp.lt.s32.totalorder %s1275_s28, %s1268_s24 }
  0x26   : > { %p1272_p9 = pneg %p1271_p7  ;;  %p1278_p12 = por %p1277_p11, %p1276_p3 }
  0x28   : > { %p1279_p13 = pnand %p1278_p12, %p1272_p9 }
  0x2a   : > { %1282 = shalt.err (!%p1279_p13)
}
  0x2b   : > { %1126 = dma.hbm_to_vmem [thread:$0]  (!%p1494_p6), %s1492_s7, 256, %s1498_s9, %s1502_s12  }
  0x2c   : > { %s225_s29 = scalar_lea.vmem [#allocation7], %s1500_s11  ;;  %s1532_s6 = sadd.s32 4294967295, %s1411_s21  }
  0x2d   : > { %s232_s30 = sshll.u32 %s225_s29, 4  ;;  %s1052_s8 = sadd.s32 4294967294, %s1411_s21   ;;  %s1559_s30 = int_to_ptr.vmem [resolvable:$true] %s232_s30 }
  0x2e   : > { %p63_p3 = scmp.ne.s32.totalorder %s1403_s19, %s1399_s18  ;;  %p2085_p10 = scmp.eq.s32.totalorder %s1532_s6, 0 }
  0x2f   : > { %p165_p1 = scmp.eq.s32.totalorder %s1532_s6, 1  ;;  %p171_p2 = scmp.eq.s32.totalorder %s1052_s8, 1 }
  0x30   : > { %p1541_p4 = por %p2085_p10, %p63_p3  ;;  %p1053_p5 = scmp.ge.s32.totalorder %s1411_s21, 1 }
  0x31   : > { %p1549_p7 = por %p165_p1, %p57_p0  ;;  %p1553_p9 = por %p171_p2, %p63_p3 }
  0x32   : > { %s2093_s13 = scalar_select %p1541_p4, 1, 0 }
  0x33   : > { %s2094_s7 = scalar_select %p1549_p7, 1, 0 }
  0x34   : > { %s2095_s9 = scalar_select %p1553_p9, 1, 0 }
  0x35   : > { %p178_p11 = scmp.lt.s32.totalorder %s1411_s21, 3  ;;  %s1107_s11 = sshll.u32 %s1411_s21, 12 }
  0x36   : > { %s1414_s15 = smov [#allocation2]   ;;  %s2097_s2 = sld [smem:[#allocation13_spill]] }
  0x37   : > { %p1561_p12 = pnand %p1053_p5, %p178_p11  ;;  %s191_s16 = sshll.u32 %s1414_s15, 4  ;;  %s1572_s16 = int_to_ptr.vmem [resolvable:$true] %s191_s16 }
  0x39   : > { %s2096_s14 = scalar_select %p1561_p12, 1, 0 }
  0x3a   : > { %p1119_p0 = pneg %p1561_p12 }
  0x3c   : > { %s1568_s24 = scalar_lea.hbm %s2097_s2, %s1107_s11  ;;  %p1576_p13 = pnand %p1119_p0, %p2085_p10 }
  0x3d   : > { %s1283_s27 = scalar_lea.hbm %s1568_s24, 4096  ;;  %s1288_s8 = scalar_lea.hbm %s2097_s2, 8192 }
  0x3e   : > { %p1284_p3 = scmp.ne.s32.totalorder %s1568_s24, %s1283_s27  ;;  %p1289_p5 = scmp.lt.u32.totalorder %s1568_s24, %s2097_s2 }
  0x3f   : > { %p1290_p11 = scmp.lt.u32.totalorder %s1288_s8, %s1283_s27  ;;  %p1292_p0 = scmp.lt.u32.totalorder %s1283_s27, %s1568_s24 }
  0x40   : > { %p1286_p1 = pnand %p1284_p3, %p1255_p8 }
  0x41   : > { %p1291_p9 = por %p1290_p11, %p1289_p5 }
  0x42   : > { %p1287_p2 = pneg %p1286_p1 }
  0x43   : > { %p1293_p10 = por %p1292_p0, %p1291_p9 }
  0x45   : > { %p1294_p7 = pnand %p1293_p10, %p1287_p2 }
  0x47   : > { %1297 = shalt.err (!%p1294_p7)
}
  0x48   : > { %s1298_s17 = scalar_lea.vmem %s1559_s30, 4096  ;;  %s1415_s23 = smov [#allocation7]  }
  0x49   : > { %p1299_p3 = scmp.ne.s32.totalorder %s1559_s30, %s1298_s17  ;;  %s1303_s28 = sshll.u32 %s1415_s23, 4  ;;  %s1304_s28 = int_to_ptr.vmem [resolvable:$false] %s1303_s28 }
  0x4a   : > { %s1305_s29 = scalar_lea.vmem %s1304_s28, 8192  ;;  %p1306_p12 = scmp.lt.s32.totalorder %s1559_s30, %s1304_s28 }
  0x4b   : > { %p1301_p1 = pnand %p1299_p3, %p1255_p8  ;;  %p1307_p5 = scmp.lt.s32.totalorder %s1305_s29, %s1298_s17 }
  0x4d   : > { %p1302_p4 = pneg %p1301_p1  ;;  %p1308_p11 = por %p1307_p5, %p1306_p12 }
  0x4f   : > { %p1309_p9 = pnand %p1308_p11, %p1302_p4 }
  0x51   : > { %1312 = shalt.err (!%p1309_p9)
}
  0x52   : > { %s1416_s27 = smov 128   ;;  %s1417_s8 = smov 8  }
  0x53   : > { %1129 = dma.hbm_to_vmem [thread:$0]  (!%p1494_p6), %s1568_s24, 4096, %s1559_s30, %s1502_s12, %s1416_s27, %s1416_s27, %s1417_s8  }
  0x54   : > { %s1313_s23 = scalar_lea.hbm %s2079_s0, 256  ;;  %p1315_p10 = pneg %p1576_p13 }
  0x55   : > { %p1314_p8 = scmp.ne.s32.totalorder %s2079_s0, %s1313_s23  ;;  %p1320_p12 = scmp.lt.u32.totalorder %s1313_s23, %s2079_s0 }
  0x57   : > { %p1316_p4 = pnand %p1315_p10, %p1314_p8 }
  0x59   : > { %p1317_p7 = pneg %p1316_p4 }
  0x5b   : > { %p1322_p2 = pnand %p1320_p12, %p1317_p7 }
  0x5d   : > { %1325 = shalt.err (!%p1322_p2)
}
  0x5e   : > { %s1326_s10 = scalar_lea.vmem %s1572_s16, 256  ;;  %p1334_p1 = scmp.lt.s32.totalorder %s1572_s16, %s1572_s16 }
  0x5f   : > { %p1327_p6 = scmp.ne.s32.totalorder %s1572_s16, %s1326_s10  ;;  %p1335_p5 = scmp.lt.s32.totalorder %s1326_s10, %s1326_s10 }
  0x61   : > { %p1329_p0 = pnand %p1327_p6, %p1315_p10  ;;  %p1336_p11 = por %p1335_p5, %p1334_p1 }
  0x63   : > { %p1330_p3 = pneg %p1329_p0 }
  0x65   : > { %p1337_p9 = pnand %p1336_p11, %p1330_p3 }
  0x67   : > { %1340 = shalt.err (!%p1337_p9)
}
  0x68   : > { %1122 = dma.hbm_to_vmem [thread:$0]  (!%p1576_p13), %s2079_s0, 256, %s1572_s16, [#allocation3]  }
  0x69   : > { %p2099_p8 = scmp.ne.s32.totalorder %s2096_s14, 0 }
  0x6a   : > { %p2100_p4 = scmp.eq.s32.totalorder (!%p2099_p8), %s1532_s6, 0 }
  0x6b   : > { %258 = sbr.rel (%p2099_p8) target bundleno = 2030 (0x7ee), region = 40 }
  0x72   : > { %1386 = dma.done.wait (%p2100_p4), [#allocation3], 256   ;;  %p2101_p10 = pmov %p2100_p4 }
  0x73   : > { %s264_s12 = sand.u32 1, %s1532_s6   ;;  %s1633_s30 = sand.u32 1, %s1403_s19  }
  0x74   : > { %1388 = vsyncadd (%p2101_p10), [#allocation3], 4294967040  ;;  %s1064_s24 = sshll.u32 %s1633_s30, 4  ;;  %s265_s26 = scalar_lea.sflag [#allocation6], %s264_s12 }
  0x75   : > { %s1638_s16 = scalar_lea.vmem [#allocation5], %s1064_s24  ;;  %p2102_p13 = scmp.ne.s32.totalorder %s2093_s13, 0 }
  0x77   : > { %1390 = dma.done.wait (%p2102_p13), %s265_s26, 4352  }
  0x78   : > { %1392 = vsyncadd (%p2102_p13), %s265_s26, 4294962944  ;;  %s1065_s14 = sshll.u32 %s1633_s30, 8  ;;  %v388_v13 = vld [vmem:[%s1638_s16 + $0x8] sm:$0xff]  ;;  %v387_v34 = vld [vmem:[%s1638_s16] sm:$0xff]  ;;  %p317_p7 = scmp.lt.s32.totalorder %s1532_s6, 1  ;;  %v362_v36 = vlaneseq }
  0x79   : > { %s1645_s29 = scalar_lea.vmem [#allocation7], %s1065_s14  ;;  %v390_v14 = vpack.c.bf16 %v388_v13, %v388_v13  ;;  %v389_v35 = vpack.c.bf16 %v387_v34, %v387_v34  ;;  %v325_v42 = vld [vmem:[#allocation2] sm:$0xff]  ;;  %v326_v45 = vld [vmem:[#allocation2 + $0x8] sm:$0xff]  ;;  %s1108_s10 = sshll.u32 %s1532_s6, 8 }
  0x7a   : > { %v1648_v0 = vld [vmem:[%s1645_s29 + $0x4] ss:$8 sps:$4 sm:$0xff]   ;;  %v1651_v1 = vld [vmem:[%s1645_s29] ss:$8 sps:$4 sm:$0xff]   ;;  %v1655_v2 = vld [vmem:[%s1645_s29 + $0x14] ss:$8 sps:$4 sm:$0xff]   ;;  %s2035_s16 = scalar_lea.hbm %s2084_s5, %s1108_s10 }
  0x7b   : > { %551 = vmatprep.subr.bf16.mxu0 %v1648_v0  ;;  %596 = vmatprep.subr.bf16.mxu1 %v1648_v0  ;;  %v1660_v3 = vld [vmem:[%s1645_s29 + $0x10] ss:$8 sps:$4 sm:$0xff]   ;;  %v1665_v4 = vld [vmem:[%s1645_s29 + $0x24] ss:$8 sps:$4 sm:$0xff]   ;;  %v1670_v5 = vld [vmem:[%s1645_s29 + $0x20] ss:$8 sps:$4 sm:$0xff]  }
  0x7c   : > { %552 = vmatpush1.bf16.msra.mxu0 %v1651_v1  ;;  %597 = vmatpush1.bf16.msra.mxu1 %v1651_v1  ;;  %v1675_v6 = vld [vmem:[%s1645_s29 + $0x34] ss:$8 sps:$4 sm:$0xff]   ;;  %v1680_v7 = vld [vmem:[%s1645_s29 + $0x30] ss:$8 sps:$4 sm:$0xff]   ;;  %v1685_v8 = vld [vmem:[%s1645_s29 + $0x44] ss:$8 sps:$4 sm:$0xff]  }
  0x7d   : > { %553 = vmatprep.subr.bf16.mxu0 %v1655_v2  ;;  %598 = vmatprep.subr.bf16.mxu1 %v1655_v2  ;;  %v1690_v9 = vld [vmem:[%s1645_s29 + $0x40] ss:$8 sps:$4 sm:$0xff]   ;;  %v1695_v10 = vld [vmem:[%s1645_s29 + $0x54] ss:$8 sps:$4 sm:$0xff]   ;;  %v1700_v11 = vld [vmem:[%s1645_s29 + $0x50] ss:$8 sps:$4 sm:$0xff]  }
  0x7e   : > { %v1705_v12 = vld [vmem:[%s1645_s29 + $0x64] ss:$8 sps:$4 sm:$0xff]   ;;  %v1711_v15 = vld [vmem:[%s1645_s29 + $0x60] ss:$8 sps:$4 sm:$0xff]   ;;  %v1716_v16 = vld [vmem:[%s1645_s29 + $0x74] ss:$8 sps:$4 sm:$0xff]   ;;  %583 = vmatprep.mubr.bf16.mxu0 %v390_v14 }
  0x7f   : > { %v1721_v17 = vld [vmem:[%s1645_s29 + $0x70] ss:$8 sps:$4 sm:$0xff]   ;;  %v1726_v18 = vld [vmem:[%s1645_s29 + $0x84] ss:$8 sps:$4 sm:$0xff]   ;;  %v1731_v19 = vld [vmem:[%s1645_s29 + $0x80] ss:$8 sps:$4 sm:$0xff]  }
  0x80   : > { %554 = vmatpush1.bf16.msra.mxu0 %v1660_v3  ;;  %599 = vmatpush1.bf16.msra.mxu1 %v1660_v3  ;;  %v1736_v20 = vld [vmem:[%s1645_s29 + $0x94] ss:$8 sps:$4 sm:$0xff]   ;;  %v1741_v21 = vld [vmem:[%s1645_s29 + $0x90] ss:$8 sps:$4 sm:$0xff]   ;;  %v1746_v22 = vld [vmem:[%s1645_s29 + $0xa4] ss:$8 sps:$4 sm:$0xff]  }
  0x81   : > { %555 = vmatprep.subr.bf16.mxu0 %v1665_v4  ;;  %600 = vmatprep.subr.bf16.mxu1 %v1665_v4  ;;  %v1751_v23 = vld [vmem:[%s1645_s29 + $0xa0] ss:$8 sps:$4 sm:$0xff]   ;;  %v1756_v24 = vld [vmem:[%s1645_s29 + $0xb4] ss:$8 sps:$4 sm:$0xff]   ;;  %v1761_v25 = vld [vmem:[%s1645_s29 + $0xb0] ss:$8 sps:$4 sm:$0xff]  }
  0x82   : > { %v1766_v26 = vld [vmem:[%s1645_s29 + $0xc4] ss:$8 sps:$4 sm:$0xff]   ;;  %v1771_v27 = vld [vmem:[%s1645_s29 + $0xc0] ss:$8 sps:$4 sm:$0xff]   ;;  %v1776_v28 = vld [vmem:[%s1645_s29 + $0xd4] ss:$8 sps:$4 sm:$0xff]  }
  0x83   : > { %v1781_v29 = vld [vmem:[%s1645_s29 + $0xd0] ss:$8 sps:$4 sm:$0xff]   ;;  %v1786_v30 = vld [vmem:[%s1645_s29 + $0xe4] ss:$8 sps:$4 sm:$0xff]   ;;  %v1791_v31 = vld [vmem:[%s1645_s29 + $0xe0] ss:$8 sps:$4 sm:$0xff]  }
  0x84   : > { %556 = vmatpush1.bf16.msra.mxu0 %v1670_v5  ;;  %601 = vmatpush1.bf16.msra.mxu1 %v1670_v5  ;;  %v1796_v32 = vld [vmem:[%s1645_s29 + $0xf4] ss:$8 sps:$4 sm:$0xff]   ;;  %v1801_v33 = vld [vmem:[%s1645_s29 + $0xf0] ss:$8 sps:$4 sm:$0xff]   ;;  %s318_s13 = scalar_select %p317_p7, %s1532_s6, 1  ;;  %v363_v37 = vshrl.u32 %v362_v36, 7 }
  0x85   : > { %557 = vmatprep.subr.bf16.mxu0 %v1675_v6  ;;  %602 = vmatprep.subr.bf16.mxu1 %v1675_v6  ;;  %s316_s1 = scalar_lea.vmem [#allocation8], %s1064_s24  ;;  %s912_s14 = scalar_lea.sflag [#allocation4], %s1633_s30 }
  0x86   : > { %s1067_s27 = sshll.u32 %s318_s13, 1  ;;  %v364_v38 = vsub.s32 0, %v363_v37  ;;  %v368_v40 = vsub.s32 1, %v363_v37  ;;  %s926_s2 = sshll.u32 %s316_s1, 4  ;;  %s2037_s2 = int_to_ptr.vmem [resolvable:$true] %s926_s2 }
  0x87   : > { %s324_s15 = scalar_lea.vmem %s2083_s4, %s1067_s27  ;;  %s320_s28 = scalar_lea.vmem %s2082_s3, %s1067_s27 }
  0x88   : > { %558 = vmatpush1.bf16.msra.mxu0 %v1680_v7  ;;  %603 = vmatpush1.bf16.msra.mxu1 %v1680_v7  ;;  %v360_v39 = vld [vmem:[%s324_s15] sm:$0x3]  ;;  %s1341_s29 = scalar_lea.vmem %s2037_s2, 256  ;;  %p2103_p2 = scmp.ne.s32.totalorder %s2094_s7, 0 }
  0x89   : > { %559 = vmatprep.subr.bf16.mxu0 %v1685_v8  ;;  %604 = vmatprep.subr.bf16.mxu1 %v1685_v8  ;;  %v365_v41 = vrot.slane %v360_v39, %v364_v38  ;;  %v359_v43 = vld [vmem:[%s320_s28] sm:$0x3]  ;;  %v369_v44 = vrot.slane %v360_v39, %v368_v40  ;;  %p1342_p12 = scmp.ne.s32.totalorder %s2037_s2, %s1341_s29  ;;  %s1418_s6 = smov [#allocation8]  }
  0x8a   : > { %v378_v47 = vrot.slane %v359_v43, %v364_v38  ;;  %v382_v49 = vrot.slane %v359_v43, %v368_v40  ;;  %s1345_s24 = sshll.u32 %s1418_s6, 4  ;;  %s1346_s24 = int_to_ptr.vmem [resolvable:$false] %s1345_s24 }
  0x8b   : > { %v372_v46 = vmul.f32 %v365_v41, %v325_v42  ;;  %v373_v48 = vmul.f32 %v369_v44, %v326_v45  ;;  %p1343_p6 = pnand %p1342_p12, %p2103_p2  ;;  %s1347_s13 = scalar_lea.vmem %s1346_s24, 512 }
  0x8c   : > { %560 = vmatpush1.bf16.msra.mxu0 %v1690_v9  ;;  %605 = vmatpush1.bf16.msra.mxu1 %v1690_v9  ;;  %p1348_p3 = scmp.lt.s32.totalorder %s2037_s2, %s1346_s24  ;;  %p1349_p1 = scmp.lt.s32.totalorder %s1347_s13, %s1341_s29 }
  0x8d   : > { %561 = vmatprep.subr.bf16.mxu0 %v1695_v10  ;;  %606 = vmatprep.subr.bf16.mxu1 %v1695_v10  ;;  %v1851_v50 = vadd.f32 %v378_v47, %v372_v46  ;;  %v1853_v51 = vadd.f32 %v382_v49, %v373_v48  ;;  %p1344_p0 = pneg %p1343_p6 }
  0x8e   : > { %p1350_p5 = por %p1349_p1, %p1348_p3 }
  0x90   : > { %562 = vmatpush1.bf16.msra.mxu0 %v1700_v11  ;;  %607 = vmatpush1.bf16.msra.mxu1 %v1700_v11  ;;  %p1351_p11 = pnand %p1350_p5, %p1344_p0 }
  0x91   : > { %563 = vmatprep.subr.bf16.mxu0 %v1705_v12  ;;  %608 = vmatprep.subr.bf16.mxu1 %v1705_v12 }
  0x94   : > { %564 = vmatpush1.bf16.msra.mxu0 %v1711_v15  ;;  %609 = vmatpush1.bf16.msra.mxu1 %v1711_v15 }
  0x95   : > { %565 = vmatprep.subr.bf16.mxu0 %v1716_v16  ;;  %610 = vmatprep.subr.bf16.mxu1 %v1716_v16 }
  0x98   : > { %566 = vmatpush1.bf16.msra.mxu0 %v1721_v17  ;;  %611 = vmatpush1.bf16.msra.mxu1 %v1721_v17 }
  0x99   : > { %567 = vmatprep.subr.bf16.mxu0 %v1726_v18  ;;  %612 = vmatprep.subr.bf16.mxu1 %v1726_v18 }
  0x9c   : > { %568 = vmatpush1.bf16.msra.mxu0 %v1731_v19  ;;  %613 = vmatpush1.bf16.msra.mxu1 %v1731_v19 }
  0x9d   : > { %569 = vmatprep.subr.bf16.mxu0 %v1736_v20  ;;  %614 = vmatprep.subr.bf16.mxu1 %v1736_v20 }
  0xa0   : > { %570 = vmatpush1.bf16.msra.mxu0 %v1741_v21  ;;  %615 = vmatpush1.bf16.msra.mxu1 %v1741_v21 }
  0xa1   : > { %571 = vmatprep.subr.bf16.mxu0 %v1746_v22  ;;  %616 = vmatprep.subr.bf16.mxu1 %v1746_v22 }
  0xa4   : > { %572 = vmatpush1.bf16.msra.mxu0 %v1751_v23  ;;  %617 = vmatpush1.bf16.msra.mxu1 %v1751_v23 }
  0xa5   : > { %573 = vmatprep.subr.bf16.mxu0 %v1756_v24  ;;  %618 = vmatprep.subr.bf16.mxu1 %v1756_v24 }
  0xa8   : > { %574 = vmatpush1.bf16.msra.mxu0 %v1761_v25  ;;  %619 = vmatpush1.bf16.msra.mxu1 %v1761_v25 }
  0xa9   : > { %575 = vmatprep.subr.bf16.mxu0 %v1766_v26  ;;  %620 = vmatprep.subr.bf16.mxu1 %v1766_v26 }
  0xac   : > { %576 = vmatpush1.bf16.msra.mxu0 %v1771_v27  ;;  %621 = vmatpush1.bf16.msra.mxu1 %v1771_v27 }
  0xad   : > { %577 = vmatprep.subr.bf16.mxu0 %v1776_v28  ;;  %622 = vmatprep.subr.bf16.mxu1 %v1776_v28 }
  0xb0   : > { %578 = vmatpush1.bf16.msra.mxu0 %v1781_v29  ;;  %623 = vmatpush1.bf16.msra.mxu1 %v1781_v29 }
  0xb1   : > { %579 = vmatprep.subr.bf16.mxu0 %v1786_v30  ;;  %624 = vmatprep.subr.bf16.mxu1 %v1786_v30 }
  0xb4   : > { %580 = vmatpush1.bf16.msra.mxu0 %v1791_v31  ;;  %625 = vmatpush1.bf16.msra.mxu1 %v1791_v31 }
  0xb5   : > { %581 = vmatprep.subr.bf16.mxu0 %v1796_v32  ;;  %626 = vmatprep.subr.bf16.mxu1 %v1796_v32 }
  0xb8   : > { %582 = vmatpush1.bf16.msra.mxu0 %v1801_v33  ;;  %627 = vmatpush1.bf16.msra.mxu1 %v1801_v33 }
  0xb9   : > { %641 = vmatprep.subr.bf16.mxu0 %v1648_v0  ;;  %686 = vmatprep.subr.bf16.mxu1 %v1648_v0 }
  0xbb   : > { %584 = vmatmul.mubr.bf16.vlgmr.msra.gmra.mrb[0].mxu0 %v389_v35 }
  0xbc   : > { %642 = vmatpush1.bf16.msra.mxu0 %v1651_v1 }
  0xbd   : > { %643 = vmatprep.subr.bf16.mxu0 %v1655_v2 }
  0xc0   : > { %644 = vmatpush1.bf16.msra.mxu0 %v1660_v3 }
  0xc1   : > { %645 = vmatprep.subr.bf16.mxu0 %v1665_v4 }
  0xc4   : > { %646 = vmatpush1.bf16.msra.mxu0 %v1670_v5 }
  0xc5   : > { %647 = vmatprep.subr.bf16.mxu0 %v1675_v6 }
  0xc8   : > { %648 = vmatpush1.bf16.msra.mxu0 %v1680_v7 }
  0xc9   : > { %649 = vmatprep.subr.bf16.mxu0 %v1685_v8 }
  0xcc   : > { %650 = vmatpush1.bf16.msra.mxu0 %v1690_v9 }
  0xcd   : > { %651 = vmatprep.subr.bf16.mxu0 %v1695_v10 }
  0xd0   : > { %652 = vmatpush1.bf16.msra.mxu0 %v1700_v11 }
  0xd1   : > { %653 = vmatprep.subr.bf16.mxu0 %v1705_v12 }
  0xd4   : > { %654 = vmatpush1.bf16.msra.mxu0 %v1711_v15 }
  0xd5   : > { %655 = vmatprep.subr.bf16.mxu0 %v1716_v16 }
  0xd8   : > { %656 = vmatpush1.bf16.msra.mxu0 %v1721_v17 }
  0xd9   : > { %657 = vmatprep.subr.bf16.mxu0 %v1726_v18 }
  0xdc   : > { %658 = vmatpush1.bf16.msra.mxu0 %v1731_v19 }
  0xdd   : > { %659 = vmatprep.subr.bf16.mxu0 %v1736_v20 }
  0xe0   : > { %660 = vmatpush1.bf16.msra.mxu0 %v1741_v21 }
  0xe1   : > { %661 = vmatprep.subr.bf16.mxu0 %v1746_v22 }
  0xe4   : > { %662 = vmatpush1.bf16.msra.mxu0 %v1751_v23 }
  0xe5   : > { %663 = vmatprep.subr.bf16.mxu0 %v1756_v24 }
  0xe8   : > { %664 = vmatpush1.bf16.msra.mxu0 %v1761_v25 }
  0xe9   : > { %665 = vmatprep.subr.bf16.mxu0 %v1766_v26 }
  0xec   : > { %666 = vmatpush1.bf16.msra.mxu0 %v1771_v27 }
  0xed   : > { %667 = vmatprep.subr.bf16.mxu0 %v1776_v28 }
  0xf0   : > { %668 = vmatpush1.bf16.msra.mxu0 %v1781_v29 }
  0xf1   : > { %669 = vmatprep.subr.bf16.mxu0 %v1786_v30 }
  0xf4   : > { %670 = vmatpush1.bf16.msra.mxu0 %v1791_v31 }
  0xf5   : > { %671 = vmatprep.subr.bf16.mxu0 %v1796_v32 }
  0xf8   : > { %672 = vmatpush1.bf16.msra.mxu0 %v1801_v33 }
  0xf9   : > { %731 = vmatprep.subr.bf16.mxu0 %v1648_v0 }
 0x18e   : > { %v585_v52 = vpop.f32.mrb[0].mxu0 }
 0x18f   : > { %v586_v53 = vadd.f32 %v585_v52, %v1851_v50  ;;  %v587_v54 = vpop.f32.mrb[1].mxu0 }
 0x190   : > { %v588_v55 = vadd.f32 %v587_v54, %v1853_v51  ;;  %v589_v56 = vpop.f32.mrb[2].mxu0 }
 0x191   : > { %1221 = vtanh.f32 %v586_v53  ;;  %v590_v57 = vpop.f32.mrb[3].mxu0 }
 0x192   : > { %1223 = vtanh.f32 %v588_v55 }
 0x19b   : > { %v1222_v58 = vpop.eup %1221 }
 0x19c   : > { %v1224_v59 = vpop.eup %1223  ;;  %v594_v61 = vpack.c.bf16 %v1222_v58, %v1222_v58 }
 0x19d   : > { %v595_v60 = vpack.c.bf16 %v1224_v59, %v1224_v59 }
 0x19f   : > { %628 = vmatprep.mubr.bf16.mxu1 %v595_v60 }
 0x1a0   : > { %629 = vmatmul.mubr.bf16.vlgmr.msra.gmra.mrb[0].mxu1 %v594_v61 }
 0x1a1   : > { %687 = vmatpush1.bf16.msra.mxu1 %v1651_v1 }
 0x1a2   : > { %688 = vmatprep.subr.bf16.mxu1 %v1655_v2 }
 0x1a5   : > { %689 = vmatpush1.bf16.msra.mxu1 %v1660_v3 }
 0x1a6   : > { %690 = vmatprep.subr.bf16.mxu1 %v1665_v4 }
 0x1a9   : > { %691 = vmatpush1.bf16.msra.mxu1 %v1670_v5 }
 0x1aa   : > { %692 = vmatprep.subr.bf16.mxu1 %v1675_v6 }
 0x1ad   : > { %693 = vmatpush1.bf16.msra.mxu1 %v1680_v7 }
 0x1ae   : > { %694 = vmatprep.subr.bf16.mxu1 %v1685_v8 }
 0x1b1   : > { %695 = vmatpush1.bf16.msra.mxu1 %v1690_v9 }
 0x1b2   : > { %696 = vmatprep.subr.bf16.mxu1 %v1695_v10 }
 0x1b5   : > { %697 = vmatpush1.bf16.msra.mxu1 %v1700_v11 }
 0x1b6   : > { %698 = vmatprep.subr.bf16.mxu1 %v1705_v12 }
 0x1b9   : > { %699 = vmatpush1.bf16.msra.mxu1 %v1711_v15 }
 0x1ba   : > { %700 = vmatprep.subr.bf16.mxu1 %v1716_v16 }
 0x1bd   : > { %701 = vmatpush1.bf16.msra.mxu1 %v1721_v17 }
 0x1be   : > { %702 = vmatprep.subr.bf16.mxu1 %v1726_v18 }
 0x1c1   : > { %703 = vmatpush1.bf16.msra.mxu1 %v1731_v19 }
 0x1c2   : > { %704 = vmatprep.subr.bf16.mxu1 %v1736_v20 }
 0x1c5   : > { %705 = vmatpush1.bf16.msra.mxu1 %v1741_v21 }
 0x1c6   : > { %706 = vmatprep.subr.bf16.mxu1 %v1746_v22 }
 0x1c9   : > { %707 = vmatpush1.bf16.msra.mxu1 %v1751_v23 }
 0x1ca   : > { %708 = vmatprep.subr.bf16.mxu1 %v1756_v24 }
 0x1cd   : > { %709 = vmatpush1.bf16.msra.mxu1 %v1761_v25 }
 0x1ce   : > { %710 = vmatprep.subr.bf16.mxu1 %v1766_v26 }
 0x1d1   : > { %711 = vmatpush1.bf16.msra.mxu1 %v1771_v27 }
 0x1d2   : > { %712 = vmatprep.subr.bf16.mxu1 %v1776_v28 }
 0x1d5   : > { %713 = vmatpush1.bf16.msra.mxu1 %v1781_v29 }
 0x1d6   : > { %714 = vmatprep.subr.bf16.mxu1 %v1786_v30 }
 0x1d9   : > { %715 = vmatpush1.bf16.msra.mxu1 %v1791_v31 }
 0x1da   : > { %716 = vmatprep.subr.bf16.mxu1 %v1796_v32 }
 0x1dd   : > { %717 = vmatpush1.bf16.msra.mxu1 %v1801_v33 }
 0x1de   : > { %776 = vmatprep.subr.bf16.mxu1 %v1648_v0 }
 0x273   : > { %v630_v62 = vpop.f32.mrb[0].mxu1 }
 0x274   : > { %v631_v63 = vadd.f32 %v630_v62, %v1851_v50  ;;  %v632_v13 = vpop.f32.mrb[1].mxu1 }
 0x275   : > { %v633_v14 = vadd.f32 %v632_v13, %v1853_v51  ;;  %v634_v34 = vpop.f32.mrb[2].mxu1 }
 0x276   : > { %1225 = vtanh.f32 %v631_v63  ;;  %v635_v35 = vpop.f32.mrb[3].mxu1 }
 0x277   : > { %1227 = vtanh.f32 %v633_v14 }
 0x280   : > { %v1226_v36 = vpop.eup %1225 }
 0x281   : > { %v1228_v37 = vpop.eup %1227  ;;  %v639_v39 = vpack.c.bf16 %v1226_v36, %v1226_v36 }
 0x282   : > { %v640_v38 = vpack.c.bf16 %v1228_v37, %v1228_v37 }
 0x284   : > { %673 = vmatprep.mubr.bf16.mxu0 %v640_v38 }
 0x285   : > { %674 = vmatmul.mubr.bf16.vlgmr.msra.gmra.mrb[4].mxu0 %v639_v39 }
 0x286   : > { %732 = vmatpush1.bf16.msra.mxu0 %v1651_v1 }
 0x287   : > { %733 = vmatprep.subr.bf16.mxu0 %v1655_v2 }
 0x28a   : > { %734 = vmatpush1.bf16.msra.mxu0 %v1660_v3 }
 0x28b   : > { %735 = vmatprep.subr.bf16.mxu0 %v1665_v4 }
 0x28e   : > { %736 = vmatpush1.bf16.msra.mxu0 %v1670_v5 }
 0x28f   : > { %737 = vmatprep.subr.bf16.mxu0 %v1675_v6 }
 0x292   : > { %738 = vmatpush1.bf16.msra.mxu0 %v1680_v7 }
 0x293   : > { %739 = vmatprep.subr.bf16.mxu0 %v1685_v8 }
 0x296   : > { %740 = vmatpush1.bf16.msra.mxu0 %v1690_v9 }
 0x297   : > { %741 = vmatprep.subr.bf16.mxu0 %v1695_v10 }
 0x29a   : > { %742 = vmatpush1.bf16.msra.mxu0 %v1700_v11 }
 0x29b   : > { %743 = vmatprep.subr.bf16.mxu0 %v1705_v12 }
 0x29e   : > { %744 = vmatpush1.bf16.msra.mxu0 %v1711_v15 }
 0x29f   : > { %745 = vmatprep.subr.bf16.mxu0 %v1716_v16 }
 0x2a2   : > { %746 = vmatpush1.bf16.msra.mxu0 %v1721_v17 }
 0x2a3   : > { %747 = vmatprep.subr.bf16.mxu0 %v1726_v18 }
 0x2a6   : > { %748 = vmatpush1.bf16.msra.mxu0 %v1731_v19 }
 0x2a7   : > { %749 = vmatprep.subr.bf16.mxu0 %v1736_v20 }
 0x2aa   : > { %750 = vmatpush1.bf16.msra.mxu0 %v1741_v21 }
 0x2ab   : > { %751 = vmatprep.subr.bf16.mxu0 %v1746_v22 }
 0x2ae   : > { %752 = vmatpush1.bf16.msra.mxu0 %v1751_v23 }
 0x2af   : > { %753 = vmatprep.subr.bf16.mxu0 %v1756_v24 }
 0x2b2   : > { %754 = vmatpush1.bf16.msra.mxu0 %v1761_v25 }
 0x2b3   : > { %755 = vmatprep.subr.bf16.mxu0 %v1766_v26 }
 0x2b6   : > { %756 = vmatpush1.bf16.msra.mxu0 %v1771_v27 }
 0x2b7   : > { %757 = vmatprep.subr.bf16.mxu0 %v1776_v28 }
 0x2ba   : > { %758 = vmatpush1.bf16.msra.mxu0 %v1781_v29 }
 0x2bb   : > { %759 = vmatprep.subr.bf16.mxu0 %v1786_v30 }
 0x2be   : > { %760 = vmatpush1.bf16.msra.mxu0 %v1791_v31 }
 0x2bf   : > { %761 = vmatprep.subr.bf16.mxu0 %v1796_v32 }
 0x2c2   : > { %762 = vmatpush1.bf16.msra.mxu0 %v1801_v33 }
 0x2c3   : > { %821 = vmatprep.subr.bf16.mxu0 %v1648_v0 }
 0x358   : > { %v675_v40 = vpop.f32.mrb[4].mxu0 }
 0x359   : > { %v676_v41 = vadd.f32 %v675_v40, %v1851_v50  ;;  %v677_v42 = vpop.f32.mrb[5].mxu0 }
 0x35a   : > { %v678_v43 = vadd.f32 %v677_v42, %v1853_v51  ;;  %v679_v44 = vpop.f32.mrb[6].mxu0 }
 0x35b   : > { %1229 = vtanh.f32 %v676_v41  ;;  %v680_v45 = vpop.f32.mrb[7].mxu0 }
 0x35c   : > { %1231 = vtanh.f32 %v678_v43 }
 0x365   : > { %v1230_v46 = vpop.eup %1229 }
 0x366   : > { %v1232_v47 = vpop.eup %1231  ;;  %v684_v49 = vpack.c.bf16 %v1230_v46, %v1230_v46 }
 0x367   : > { %v685_v48 = vpack.c.bf16 %v1232_v47, %v1232_v47 }
 0x369   : > { %718 = vmatprep.mubr.bf16.mxu1 %v685_v48 }
 0x36a   : > { %719 = vmatmul.mubr.bf16.vlgmr.msra.gmra.mrb[4].mxu1 %v684_v49 }
 0x36b   : > { %777 = vmatpush1.bf16.msra.mxu1 %v1651_v1 }
 0x36c   : > { %778 = vmatprep.subr.bf16.mxu1 %v1655_v2 }
 0x36f   : > { %779 = vmatpush1.bf16.msra.mxu1 %v1660_v3 }
 0x370   : > { %780 = vmatprep.subr.bf16.mxu1 %v1665_v4 }
 0x373   : > { %781 = vmatpush1.bf16.msra.mxu1 %v1670_v5 }
 0x374   : > { %782 = vmatprep.subr.bf16.mxu1 %v1675_v6 }
 0x377   : > { %783 = vmatpush1.bf16.msra.mxu1 %v1680_v7 }
 0x378   : > { %784 = vmatprep.subr.bf16.mxu1 %v1685_v8 }
 0x37b   : > { %785 = vmatpush1.bf16.msra.mxu1 %v1690_v9 }
 0x37c   : > { %786 = vmatprep.subr.bf16.mxu1 %v1695_v10 }
 0x37f   : > { %787 = vmatpush1.bf16.msra.mxu1 %v1700_v11 }
 0x380   : > { %788 = vmatprep.subr.bf16.mxu1 %v1705_v12 }
 0x383   : > { %789 = vmatpush1.bf16.msra.mxu1 %v1711_v15 }
 0x384   : > { %790 = vmatprep.subr.bf16.mxu1 %v1716_v16 }
 0x387   : > { %791 = vmatpush1.bf16.msra.mxu1 %v1721_v17 }
 0x388   : > { %792 = vmatprep.subr.bf16.mxu1 %v1726_v18 }
 0x38b   : > { %793 = vmatpush1.bf16.msra.mxu1 %v1731_v19 }
 0x38c   : > { %794 = vmatprep.subr.bf16.mxu1 %v1736_v20 }
 0x38f   : > { %795 = vmatpush1.bf16.msra.mxu1 %v1741_v21 }
 0x390   : > { %796 = vmatprep.subr.bf16.mxu1 %v1746_v22 }
 0x393   : > { %797 = vmatpush1.bf16.msra.mxu1 %v1751_v23 }
 0x394   : > { %798 = vmatprep.subr.bf16.mxu1 %v1756_v24 }
 0x397   : > { %799 = vmatpush1.bf16.msra.mxu1 %v1761_v25 }
 0x398   : > { %800 = vmatprep.subr.bf16.mxu1 %v1766_v26 }
 0x39b   : > { %801 = vmatpush1.bf16.msra.mxu1 %v1771_v27 }
 0x39c   : > { %802 = vmatprep.subr.bf16.mxu1 %v1776_v28 }
 0x39f   : > { %803 = vmatpush1.bf16.msra.mxu1 %v1781_v29 }
 0x3a0   : > { %804 = vmatprep.subr.bf16.mxu1 %v1786_v30 }
 0x3a3   : > { %805 = vmatpush1.bf16.msra.mxu1 %v1791_v31 }
 0x3a4   : > { %806 = vmatprep.subr.bf16.mxu1 %v1796_v32 }
 0x3a7   : > { %807 = vmatpush1.bf16.msra.mxu1 %v1801_v33 }
 0x3a8   : > { %866 = vmatprep.subr.bf16.mxu1 %v1648_v0 }
 0x43d   : > { %v720_v52 = vpop.f32.mrb[4].mxu1 }
 0x43e   : > { %v721_v53 = vadd.f32 %v720_v52, %v1851_v50  ;;  %v722_v54 = vpop.f32.mrb[5].mxu1 }
 0x43f   : > { %v723_v55 = vadd.f32 %v722_v54, %v1853_v51  ;;  %v724_v56 = vpop.f32.mrb[6].mxu1 }
 0x440   : > { %1233 = vtanh.f32 %v721_v53  ;;  %v725_v57 = vpop.f32.mrb[7].mxu1 }
 0x441   : > { %1235 = vtanh.f32 %v723_v55 }
 0x44a   : > { %v1234_v58 = vpop.eup %1233 }
 0x44b   : > { %v1236_v59 = vpop.eup %1235  ;;  %v729_v61 = vpack.c.bf16 %v1234_v58, %v1234_v58 }
 0x44c   : > { %v730_v60 = vpack.c.bf16 %v1236_v59, %v1236_v59 }
 0x44e   : > { %763 = vmatprep.mubr.bf16.mxu0 %v730_v60 }
 0x44f   : > { %764 = vmatmul.mubr.bf16.vlgmr.msra.gmra.mrb[8].mxu0 %v729_v61 }
 0x450   : > { %822 = vmatpush1.bf16.msra.mxu0 %v1651_v1 }
 0x451   : > { %823 = vmatprep.subr.bf16.mxu0 %v1655_v2 }
 0x454   : > { %824 = vmatpush1.bf16.msra.mxu0 %v1660_v3 }
 0x455   : > { %825 = vmatprep.subr.bf16.mxu0 %v1665_v4 }
 0x458   : > { %826 = vmatpush1.bf16.msra.mxu0 %v1670_v5 }
 0x459   : > { %827 = vmatprep.subr.bf16.mxu0 %v1675_v6 }
 0x45c   : > { %828 = vmatpush1.bf16.msra.mxu0 %v1680_v7 }
 0x45d   : > { %829 = vmatprep.subr.bf16.mxu0 %v1685_v8 }
 0x460   : > { %830 = vmatpush1.bf16.msra.mxu0 %v1690_v9 }
 0x461   : > { %831 = vmatprep.subr.bf16.mxu0 %v1695_v10 }
 0x464   : > { %832 = vmatpush1.bf16.msra.mxu0 %v1700_v11 }
 0x465   : > { %833 = vmatprep.subr.bf16.mxu0 %v1705_v12 }
 0x468   : > { %834 = vmatpush1.bf16.msra.mxu0 %v1711_v15 }
 0x469   : > { %835 = vmatprep.subr.bf16.mxu0 %v1716_v16 }
 0x46c   : > { %836 = vmatpush1.bf16.msra.mxu0 %v1721_v17 }
 0x46d   : > { %837 = vmatprep.subr.bf16.mxu0 %v1726_v18 }
 0x470   : > { %838 = vmatpush1.bf16.msra.mxu0 %v1731_v19 }
 0x471   : > { %839 = vmatprep.subr.bf16.mxu0 %v1736_v20 }
 0x474   : > { %840 = vmatpush1.bf16.msra.mxu0 %v1741_v21 }
 0x475   : > { %841 = vmatprep.subr.bf16.mxu0 %v1746_v22 }
 0x478   : > { %842 = vmatpush1.bf16.msra.mxu0 %v1751_v23 }
 0x479   : > { %843 = vmatprep.subr.bf16.mxu0 %v1756_v24 }
 0x47c   : > { %844 = vmatpush1.bf16.msra.mxu0 %v1761_v25 }
 0x47d   : > { %845 = vmatprep.subr.bf16.mxu0 %v1766_v26 }
 0x480   : > { %846 = vmatpush1.bf16.msra.mxu0 %v1771_v27 }
 0x481   : > { %847 = vmatprep.subr.bf16.mxu0 %v1776_v28 }
 0x484   : > { %848 = vmatpush1.bf16.msra.mxu0 %v1781_v29 }
 0x485   : > { %849 = vmatprep.subr.bf16.mxu0 %v1786_v30 }
 0x488   : > { %850 = vmatpush1.bf16.msra.mxu0 %v1791_v31 }
 0x489   : > { %851 = vmatprep.subr.bf16.mxu0 %v1796_v32 }
 0x48c   : > { %852 = vmatpush1.bf16.msra.mxu0 %v1801_v33 }
 0x522   : > { %v765_v0 = vpop.f32.mrb[8].mxu0 }
 0x523   : > { %v766_v62 = vadd.f32 %v765_v0, %v1851_v50  ;;  %v767_v63 = vpop.f32.mrb[9].mxu0 }
 0x524   : > { %v768_v13 = vadd.f32 %v767_v63, %v1853_v51  ;;  %v769_v14 = vpop.f32.mrb[10].mxu0 }
 0x525   : > { %1237 = vtanh.f32 %v766_v62  ;;  %v770_v34 = vpop.f32.mrb[11].mxu0 }
 0x526   : > { %1239 = vtanh.f32 %v768_v13 }
 0x52f   : > { %v1238_v35 = vpop.eup %1237 }
 0x530   : > { %v1240_v36 = vpop.eup %1239  ;;  %v774_v38 = vpack.c.bf16 %v1238_v35, %v1238_v35 }
 0x531   : > { %v775_v37 = vpack.c.bf16 %v1240_v36, %v1240_v36 }
 0x533   : > { %808 = vmatprep.mubr.bf16.mxu1 %v775_v37 }
 0x534   : > { %809 = vmatmul.mubr.bf16.vlgmr.msra.gmra.mrb[8].mxu1 %v774_v38 }
 0x535   : > { %867 = vmatpush1.bf16.msra.mxu1 %v1651_v1 }
 0x536   : > { %868 = vmatprep.subr.bf16.mxu1 %v1655_v2 }
 0x539   : > { %869 = vmatpush1.bf16.msra.mxu1 %v1660_v3 }
 0x53a   : > { %870 = vmatprep.subr.bf16.mxu1 %v1665_v4 }
 0x53d   : > { %871 = vmatpush1.bf16.msra.mxu1 %v1670_v5 }
 0x53e   : > { %872 = vmatprep.subr.bf16.mxu1 %v1675_v6 }
 0x541   : > { %873 = vmatpush1.bf16.msra.mxu1 %v1680_v7 }
 0x542   : > { %874 = vmatprep.subr.bf16.mxu1 %v1685_v8 }
 0x545   : > { %875 = vmatpush1.bf16.msra.mxu1 %v1690_v9 }
 0x546   : > { %876 = vmatprep.subr.bf16.mxu1 %v1695_v10 }
 0x549   : > { %877 = vmatpush1.bf16.msra.mxu1 %v1700_v11 }
 0x54a   : > { %878 = vmatprep.subr.bf16.mxu1 %v1705_v12 }
 0x54d   : > { %879 = vmatpush1.bf16.msra.mxu1 %v1711_v15 }
 0x54e   : > { %880 = vmatprep.subr.bf16.mxu1 %v1716_v16 }
 0x551   : > { %881 = vmatpush1.bf16.msra.mxu1 %v1721_v17 }
 0x552   : > { %882 = vmatprep.subr.bf16.mxu1 %v1726_v18 }
 0x555   : > { %883 = vmatpush1.bf16.msra.mxu1 %v1731_v19 }
 0x556   : > { %884 = vmatprep.subr.bf16.mxu1 %v1736_v20 }
 0x559   : > { %885 = vmatpush1.bf16.msra.mxu1 %v1741_v21 }
 0x55a   : > { %886 = vmatprep.subr.bf16.mxu1 %v1746_v22 }
 0x55d   : > { %887 = vmatpush1.bf16.msra.mxu1 %v1751_v23 }
 0x55e   : > { %888 = vmatprep.subr.bf16.mxu1 %v1756_v24 }
 0x561   : > { %889 = vmatpush1.bf16.msra.mxu1 %v1761_v25 }
 0x562   : > { %890 = vmatprep.subr.bf16.mxu1 %v1766_v26 }
 0x565   : > { %891 = vmatpush1.bf16.msra.mxu1 %v1771_v27 }
 0x566   : > { %892 = vmatprep.subr.bf16.mxu1 %v1776_v28 }
 0x569   : > { %893 = vmatpush1.bf16.msra.mxu1 %v1781_v29 }
 0x56a   : > { %894 = vmatprep.subr.bf16.mxu1 %v1786_v30 }
 0x56d   : > { %895 = vmatpush1.bf16.msra.mxu1 %v1791_v31 }
 0x56e   : > { %896 = vmatprep.subr.bf16.mxu1 %v1796_v32 }
 0x571   : > { %897 = vmatpush1.bf16.msra.mxu1 %v1801_v33 }
 0x607   : > { %v810_v1 = vpop.f32.mrb[8].mxu1 }
 0x608   : > { %v811_v2 = vadd.f32 %v810_v1, %v1851_v50  ;;  %v812_v3 = vpop.f32.mrb[9].mxu1 }
 0x609   : > { %v813_v4 = vadd.f32 %v812_v3, %v1853_v51  ;;  %v814_v5 = vpop.f32.mrb[10].mxu1 }
 0x60a   : > { %1241 = vtanh.f32 %v811_v2  ;;  %v815_v6 = vpop.f32.mrb[11].mxu1 }
 0x60b   : > { %1243 = vtanh.f32 %v813_v4 }
 0x614   : > { %v1242_v7 = vpop.eup %1241 }
 0x615   : > { %v1244_v8 = vpop.eup %1243  ;;  %v819_v10 = vpack.c.bf16 %v1242_v7, %v1242_v7 }
 0x616   : > { %v820_v9 = vpack.c.bf16 %v1244_v8, %v1244_v8 }
 0x618   : > { %853 = vmatprep.mubr.bf16.mxu0 %v820_v9 }
 0x619   : > { %854 = vmatmul.mubr.bf16.vlgmr.msra.gmra.mrb[12].mxu0 %v819_v10 }
 0x6ec   : > { %v855_v11 = vpop.f32.mrb[12].mxu0 }
 0x6ed   : > { %v856_v12 = vadd.f32 %v855_v11, %v1851_v50  ;;  %v857_v15 = vpop.f32.mrb[13].mxu0 }
 0x6ee   : > { %v858_v16 = vadd.f32 %v857_v15, %v1853_v51  ;;  %v859_v17 = vpop.f32.mrb[14].mxu0 }
 0x6ef   : > { %1245 = vtanh.f32 %v856_v12  ;;  %v860_v18 = vpop.f32.mrb[15].mxu0 }
 0x6f0   : > { %1247 = vtanh.f32 %v858_v16 }
 0x6f9   : > { %v1246_v19 = vpop.eup %1245 }
 0x6fa   : > { %v1248_v20 = vpop.eup %1247  ;;  %v864_v22 = vpack.c.bf16 %v1246_v19, %v1246_v19 }
 0x6fb   : > { %v865_v21 = vpack.c.bf16 %v1248_v20, %v1248_v20 }
 0x6fd   : > { %898 = vmatprep.mubr.bf16.mxu1 %v865_v21 }
 0x6fe   : > { %899 = vmatmul.mubr.bf16.vlgmr.msra.gmra.mrb[12].mxu1 %v864_v22 }
 0x7d1   : > { %v900_v23 = vpop.f32.mrb[12].mxu1 }
 0x7d2   : > { %v901_v24 = vadd.f32 %v900_v23, %v1851_v50  ;;  %v902_v25 = vpop.f32.mrb[13].mxu1 }
 0x7d3   : > { %v903_v26 = vadd.f32 %v902_v25, %v1853_v51  ;;  %v904_v27 = vpop.f32.mrb[14].mxu1 }
 0x7d4   : > { %1249 = vtanh.f32 %v901_v24  ;;  %v905_v28 = vpop.f32.mrb[15].mxu1 }
 0x7d5   : > { %1251 = vtanh.f32 %v903_v26 }
 0x7de   : > { %v1250_v29 = vpop.eup %1249 }
 0x7df   : > { %v1252_v30 = vpop.eup %1251  ;;  %909 = vst [vmem:[%s316_s1] sm:$0xff] %v1250_v29 }
 0x7e0   : > { %910 = vst [vmem:[%s316_s1 + $0x8] sm:$0xff] %v1252_v30 }
 0x7e1   : > { %1354 = shalt.err (!%p1351_p11)
}
 0x7e2   : > { %s1355_s30 = scalar_lea.hbm %s2035_s16, 256  ;;  %s1359_s11 = scalar_lea.hbm %s2084_s5, 512 }
 0x7e3   : > { %p1356_p9 = scmp.ne.s32.totalorder %s2035_s16, %s1355_s30  ;;  %p1360_p10 = scmp.lt.u32.totalorder %s2035_s16, %s2084_s5 }
 0x7e4   : > { %p1361_p13 = scmp.lt.u32.totalorder %s1359_s11, %s1355_s30  ;;  %p1363_p12 = scmp.lt.u32.totalorder %s1355_s30, %s2035_s16 }
 0x7e5   : > { %p1357_p8 = pnand %p1356_p9, %p2103_p2 }
 0x7e6   : > { %p1362_p7 = por %p1361_p13, %p1360_p10 }
 0x7e7   : > { %p1358_p4 = pneg %p1357_p8 }
 0x7e8   : > { %p1364_p6 = por %p1363_p12, %p1362_p7 }
 0x7ea   : > { %p1365_p0 = pnand %p1364_p6, %p1358_p4 }
 0x7ec   : > { %1368 = shalt.err (!%p1365_p0)
}
 0x7ed   : > { %1117 = dma.vmem_to_hbm [thread:$0]  (%p2103_p2), %s2037_s2, 256, %s2035_s16, %s912_s14  }
 0x7ee PF: > { %s938_s17 = sand.u32 1, %s1399_s18   ;;  %p2104_p3 = scmp.ne.s32.totalorder %s2095_s9, 0 }
 0x7ef   : > { %p2105_p1 = scmp.ge.s32.totalorder %s1411_s21, 2  ;;  %s939_s28 = scalar_lea.sflag [#allocation4], %s938_s17 }
 0x7f1   : > { %p1131_p5 = pnand %p2105_p1, %p2104_p3 }
 0x7f3   : > { %1394 = dma.done.wait (!%p1131_p5), %s939_s28, 256  }
 0x7f4   : > { %1396 = vsyncadd (!%p1131_p5), %s939_s28, 4294967040  ;;  %p19_p11 = scmp.ge.s32.totalorder %s1470_s22, 4   ;;  %s2106_s18 = smov %s1403_s19 }
 0x7f5   : > { %s2107_s19 = smov %s1407_s20  ;;  %s2108_s20 = smov %s1481_s25 }
 0x7f6   : > { %s2109_s21 = smov %s1470_s22  ;;  %21 = sbr.rel (!%p19_p11) target bundleno = 9 (0x9), region = 107 }
 0x7fd   :  { %944 = vsyncpa [#allocation3], 1 }
 0x7fe   :  { %946 = vsyncpa [#allocation3 + $0x1], 1 }
 0x7ff   :  { %947 = vsyncpa [#allocation6], 1 }
 0x800   :  { %949 = vsyncpa [#allocation6 + $0x1], 1 }
 0x801   :  { %950 = vsyncpa [#allocation4], 1 }
 0x802   :  { %952 = vsyncpa [#allocation4 + $0x1], 1 }

</bundles_post_ra>
